<compile_context>
chip_gen: v7x
topology: tpu7x:2x2x1
jax: 0.10.0
libtpu: 0.0.40
codegen_flags: <defaults>
</compile_context>

<pallas_src>
import jax
import jax.numpy as jnp
from jax.experimental import pallas as pl
from jax.experimental.pallas import tpu as pltpu

LATENT_SIZE = 100
CLASS_SIZE = 3
DATA_DIM = 16                              # small synthetic "data.size(1)"
IN_DIM = LATENT_SIZE + CLASS_SIZE - 2      # 101
IN_PAD = 128                               # lane-dense padded K for layer 1
BIAS_COL = IN_DIM                          # column 101 carries the constant 1.0
OUT_PAD = 128                              # lane-dense padded output width
H1 = 256
H2 = 512
TB_MAX = 1024                              # max batch tile (VMEM-safe on v7x 64 MiB)


def _generator_kernel(x_ref, w1_ref, w2_ref, b2_ref, w3_ref, b3_ref, o_ref):
    # Layer 1: Linear(128 -> 256) + ReLU.  Bias is folded into w1 (row 101)
    # and consumed by the constant 1.0 column of x -> no VPU bias add needed.
    h = jnp.dot(x_ref[...], w1_ref[...], preferred_element_type=jnp.float32)
    h = jnp.maximum(h, 0.0)
    # Layer 2: Linear(256 -> 512) + ReLU  (bf16 MXU feed, f32 accumulation).
    h = jnp.dot(h.astype(jnp.bfloat16), w2_ref[...], preferred_element_type=jnp.float32)
    h = jnp.maximum(h + b2_ref[...], 0.0)
    # Layer 3: Linear(512 -> 128[=padded data_dim]), no activation.
    out = jnp.dot(h.astype(jnp.bfloat16), w3_ref[...], preferred_element_type=jnp.float32)
    o_ref[...] = (out + b3_ref[...]).astype(o_ref.dtype)   # bf16 store (lane-dense)


def _choose_tiles(batch):
    """Balanced, 8-aligned batch tiles: big enough to amortize grid overhead,
    at least 2 tiles when possible (v7x megacore), <= 7 pad rows per tile."""
    n_tiles = pl.cdiv(batch, TB_MAX)
    if n_tiles == 1 and batch > 16:
        n_tiles = 2
    tb = pl.cdiv(pl.cdiv(batch, n_tiles), 8) * 8
    return tb, n_tiles * tb


@jax.jit
def generator_forward(noise, labels, packed_params):
    """noise: (B, latent_size) f32, labels: (B, class_size - 2) f32 -> (B, data_dim) f32."""
    w1p, w2p, b2, w3p, b3p = packed_params
    B = noise.shape[0]
    lab_dim = labels.shape[1]
    assert LATENT_SIZE + lab_dim == IN_DIM, "noise/labels widths inconsistent with IN_DIM"

    tb, bp = _choose_tiles(B)

    # Lane-dense padded input slab, built directly in bf16 (no f32 HBM pass).
    # Replaces torch.cat: noise in cols [0:100], labels in [100:101],
    # constant 1.0 (layer-1 bias) in col 101, zeros elsewhere / in pad rows.
    x = jnp.zeros((bp, IN_PAD), jnp.bfloat16)
    x = x.at[:B, :LATENT_SIZE].set(noise.astype(jnp.bfloat16))
    x = x.at[:B, LATENT_SIZE:LATENT_SIZE + lab_dim].set(labels.astype(jnp.bfloat16))
    x = x.at[:B, BIAS_COL].set(jnp.bfloat16(1.0))

    def resident(shape):
        # Constant block index -> the block stays in VMEM across all batch tiles.
        return pl.BlockSpec(shape, lambda i: tuple(0 for _ in shape))

    out = pl.pallas_call(
        _generator_kernel,
        out_shape=jax.ShapeDtypeStruct((bp, OUT_PAD), jnp.bfloat16),
        grid=(bp // tb,),
        in_specs=[
            pl.BlockSpec((tb, IN_PAD), lambda i: (i, 0)),   # x: batch-tiled
            resident(w1p.shape),
            resident(w2p.shape), resident(b2.shape),
            resident(w3p.shape), resident(b3p.shape),
        ],
        out_specs=pl.BlockSpec((tb, OUT_PAD), lambda i: (i, 0)),
        compiler_params=pltpu.CompilerParams(
            dimension_semantics=("parallel",),              # megacore on v7x
            vmem_limit_bytes=32 * 1024 * 1024,              # safe on 64 MiB v7x VMEM
        ),
    )(x, w1p, w2p, b2, w3p, b3p)

    return out[:B, :DATA_DIM].astype(jnp.float32)


def init_params(key):
    """Deterministic synthetic parameters matching nn.Linear shapes.

    PyTorch Linear stores weight as (out, in); we keep (in, out) so the kernel
    computes x @ W + b (equivalent to x @ weight.T + bias)."""
    ks = jax.random.split(key, 6)

    def lin(kw, kb, fan_in, fan_out):
        bound = float(fan_in) ** -0.5
        w = jax.random.uniform(kw, (fan_in, fan_out), jnp.float32, -bound, bound)
        b = jax.random.uniform(kb, (1, fan_out), jnp.float32, -bound, bound)
        return w, b

    w1, b1 = lin(ks[0], ks[1], IN_DIM, H1)
    w2, b2 = lin(ks[2], ks[3], H1, H2)
    w3, b3 = lin(ks[4], ks[5], H2, DATA_DIM)
    return (w1, b1, w2, b2, w3, b3)


def pack_params(params):
    """Pad to lane-dense shapes, fold b1 into w1 (bias row), weights -> bf16."""
    w1, b1, w2, b2, w3, b3 = params
    w1p = jnp.zeros((IN_PAD, H1), jnp.float32)
    w1p = w1p.at[:IN_DIM, :].set(w1)
    w1p = w1p.at[BIAS_COL, :].set(b1[0])            # consumed by x's 1.0 column
    w1p = w1p.astype(jnp.bfloat16)
    w2p = w2.astype(jnp.bfloat16)
    w3p = jnp.zeros((H2, OUT_PAD), jnp.float32).at[:, :DATA_DIM].set(w3).astype(jnp.bfloat16)
    b3p = jnp.zeros((1, OUT_PAD), jnp.float32).at[:, :DATA_DIM].set(b3)
    return (w1p, w2p, b2, w3p, b3p)


def reference_forward(noise, labels, packed_params):
    """Plain-JAX reference mirroring the kernel math (bf16 dot inputs / output,
    f32 accumulation, folded layer-1 bias)."""
    w1p, w2p, b2, w3p, b3p = packed_params
    B = noise.shape[0]
    x = jnp.zeros((B, IN_PAD), jnp.bfloat16)
    x = x.at[:, :LATENT_SIZE].set(noise.astype(jnp.bfloat16))
    x = x.at[:, LATENT_SIZE:LATENT_SIZE + labels.shape[1]].set(labels.astype(jnp.bfloat16))
    x = x.at[:, BIAS_COL].set(jnp.bfloat16(1.0))
    h = jnp.maximum(jnp.dot(x, w1p, preferred_element_type=jnp.float32), 0.0)
    h = jnp.maximum(jnp.dot(h.astype(jnp.bfloat16), w2p,
                            preferred_element_type=jnp.float32) + b2, 0.0)
    out = jnp.dot(h.astype(jnp.bfloat16), w3p, preferred_element_type=jnp.float32) + b3p
    return out[:, :DATA_DIM].astype(jnp.bfloat16).astype(jnp.float32)


if __name__ == "__main__":
    key = jax.random.PRNGKey(0)
    k_params, k_noise, k_labels = jax.random.split(key, 3)

    params = init_params(k_params)
    packed = pack_params(params)

    # Small case (single 8-row tile after padding).
    B = 2
    noise = jax.random.normal(k_noise, (B, LATENT_SIZE), jnp.float32)
    labels = jax.random.normal(k_labels, (B, CLASS_SIZE - 2), jnp.float32)

    out = jax.block_until_ready(generator_forward(noise, labels, packed))
    ref = reference_forward(noise, labels, packed)
    assert out.shape == (B, DATA_DIM), out.shape
    assert jnp.allclose(out, ref, atol=1e-2, rtol=1e-2), float(jnp.abs(out - ref).max())

    # Multi-tile case (exercises balanced batch tiling: 300 -> 2 tiles of 152 rows).
    B2 = 300
    noise2 = jax.random.normal(jax.random.PRNGKey(7), (B2, LATENT_SIZE), jnp.float32)
    labels2 = jax.random.normal(jax.random.PRNGKey(8), (B2, CLASS_SIZE - 2), jnp.float32)
    out2 = jax.block_until_ready(generator_forward(noise2, labels2, packed))
    ref2 = reference_forward(noise2, labels2, packed)
    assert out2.shape == (B2, DATA_DIM), out2.shape
    assert jnp.allclose(out2, ref2, atol=1e-2, rtol=1e-2), float(jnp.abs(out2 - ref2).max())

    print("KERNEL_OK")
</pallas_src>

<mosaic_0001>
module attributes {stable_mosaic.version = 11 : i64} {
  func.func @_generator_kernel(%arg0: i32, %arg1: memref<8x128xbf16, #tpu.memory_space<vmem>>, %arg2: memref<128x256xbf16, #tpu.memory_space<vmem>>, %arg3: memref<256x512xbf16, #tpu.memory_space<vmem>>, %arg4: memref<1x512xf32, #tpu.memory_space<vmem>>, %arg5: memref<512x128xbf16, #tpu.memory_space<vmem>>, %arg6: memref<1x128xf32, #tpu.memory_space<vmem>>, %arg7: memref<8x128xbf16, #tpu.memory_space<vmem>>) attributes {dimension_semantics = [#tpu.dimension_semantics<parallel>], iteration_bounds = array<i64: 1>, scalar_prefetch = 0 : i64, scratch_operands = 0 : i64, tpu.core_type = #tpu.core_type<tc>, window_params = [{transform_indices = @transform_0, window_bounds = array<i64: 8, 128>}, {pipeline_mode = #tpu.pipeline_mode<synchronous>, transform_indices = @transform_1, window_bounds = array<i64: 128, 256>}, {pipeline_mode = #tpu.pipeline_mode<synchronous>, transform_indices = @transform_2, window_bounds = array<i64: 256, 512>}, {pipeline_mode = #tpu.pipeline_mode<synchronous>, transform_indices = @transform_3, window_bounds = array<i64: 1, 512>}, {pipeline_mode = #tpu.pipeline_mode<synchronous>, transform_indices = @transform_4, window_bounds = array<i64: 512, 128>}, {pipeline_mode = #tpu.pipeline_mode<synchronous>, transform_indices = @transform_5, window_bounds = array<i64: 1, 128>}, {transform_indices = @transform_6, window_bounds = array<i64: 8, 128>}]} {
    %c0 = arith.constant 0 : index
    %c0_0 = arith.constant 0 : index
    %0 = vector.load %arg1[%c0, %c0_0] : memref<8x128xbf16, #tpu.memory_space<vmem>>, vector<8x128xbf16>
    %c0_1 = arith.constant 0 : index
    %c0_2 = arith.constant 0 : index
    %1 = vector.load %arg2[%c0_1, %c0_2] : memref<128x256xbf16, #tpu.memory_space<vmem>>, vector<128x256xbf16>
    %cst = arith.constant dense<0.000000e+00> : vector<8x256xf32>
    %2 = tpu.matmul %0, %1, %cst {dimension_numbers = #tpu.dot_dimension_numbers<[1], [0], [0], [1], [0, 0, 1, 1], [], []>} : vector<8x128xbf16>, vector<128x256xbf16>, vector<8x256xf32> -> vector<8x256xf32>
    %cst_3 = arith.constant 0.000000e+00 : f32
    %3 = vector.broadcast %cst_3 : f32 to vector<8x256xf32>
    %4 = arith.maximumf %2, %3 : vector<8x256xf32>
    %5 = arith.truncf %4 : vector<8x256xf32> to vector<8x256xbf16>
    %c0_4 = arith.constant 0 : index
    %c0_5 = arith.constant 0 : index
    %6 = vector.load %arg3[%c0_4, %c0_5] : memref<256x512xbf16, #tpu.memory_space<vmem>>, vector<256x512xbf16>
    %cst_6 = arith.constant dense<0.000000e+00> : vector<8x512xf32>
    %7 = tpu.matmul %5, %6, %cst_6 {dimension_numbers = #tpu.dot_dimension_numbers<[1], [0], [0], [1], [0, 0, 1, 1], [], []>} : vector<8x256xbf16>, vector<256x512xbf16>, vector<8x512xf32> -> vector<8x512xf32>
    %c0_7 = arith.constant 0 : index
    %c0_8 = arith.constant 0 : index
    %8 = vector.load %arg4[%c0_7, %c0_8] : memref<1x512xf32, #tpu.memory_space<vmem>>, vector<1x512xf32>
    %9 = vector.broadcast %8 : vector<1x512xf32> to vector<8x512xf32>
    %10 = arith.addf %7, %9 : vector<8x512xf32>
    %cst_9 = arith.constant 0.000000e+00 : f32
    %11 = vector.broadcast %cst_9 : f32 to vector<8x512xf32>
    %12 = arith.maximumf %10, %11 : vector<8x512xf32>
    %13 = arith.truncf %12 : vector<8x512xf32> to vector<8x512xbf16>
    %c0_10 = arith.constant 0 : index
    %c0_11 = arith.constant 0 : index
    %14 = vector.load %arg5[%c0_10, %c0_11] : memref<512x128xbf16, #tpu.memory_space<vmem>>, vector<512x128xbf16>
    %cst_12 = arith.constant dense<0.000000e+00> : vector<8x128xf32>
    %15 = tpu.matmul %13, %14, %cst_12 {dimension_numbers = #tpu.dot_dimension_numbers<[1], [0], [0], [1], [0, 0, 1, 1], [], []>} : vector<8x512xbf16>, vector<512x128xbf16>, vector<8x128xf32> -> vector<8x128xf32>
    %c0_13 = arith.constant 0 : index
    %c0_14 = arith.constant 0 : index
    %16 = vector.load %arg6[%c0_13, %c0_14] : memref<1x128xf32, #tpu.memory_space<vmem>>, vector<1x128xf32>
    %17 = vector.broadcast %16 : vector<1x128xf32> to vector<8x128xf32>
    %18 = arith.addf %15, %17 : vector<8x128xf32>
    %19 = arith.truncf %18 : vector<8x128xf32> to vector<8x128xbf16>
    %c0_15 = arith.constant 0 : index
    %c0_16 = arith.constant 0 : index
    %20 = vector.load %arg7[%c0_15, %c0_16] : memref<8x128xbf16, #tpu.memory_space<vmem>>, vector<8x128xbf16>
    tpu.vector_store %arg7[%c0_15, %c0_16], %19 {strides = array<i32>} : memref<8x128xbf16, #tpu.memory_space<vmem>>, vector<8x128xbf16>,
    return
  }
  func.func @transform_0(%arg0: i32) -> (i32, i32) {
    %c0_i32 = arith.constant 0 : i32
    %c0_i32_0 = arith.constant 0 : i32
    return %arg0, %c0_i32 : i32, i32
  }
  func.func @transform_1(%arg0: i32) -> (i32, i32) {
    %c0_i32 = arith.constant 0 : i32
    %c0_i32_0 = arith.constant 0 : i32
    %c0_i32_1 = arith.constant 0 : i32
    return %c0_i32, %c0_i32_0 : i32, i32
  }
  func.func @transform_2(%arg0: i32) -> (i32, i32) {
    %c0_i32 = arith.constant 0 : i32
    %c0_i32_0 = arith.constant 0 : i32
    %c0_i32_1 = arith.constant 0 : i32
    return %c0_i32, %c0_i32_0 : i32, i32
  }
  func.func @transform_3(%arg0: i32) -> (i32, i32) {
    %c0_i32 = arith.constant 0 : i32
    %c0_i32_0 = arith.constant 0 : i32
    %c0_i32_1 = arith.constant 0 : i32
    return %c0_i32, %c0_i32_0 : i32, i32
  }
  func.func @transform_4(%arg0: i32) -> (i32, i32) {
    %c0_i32 = arith.constant 0 : i32
    %c0_i32_0 = arith.constant 0 : i32
    %c0_i32_1 = arith.constant 0 : i32
    return %c0_i32, %c0_i32_0 : i32, i32
  }
  func.func @transform_5(%arg0: i32) -> (i32, i32) {
    %c0_i32 = arith.constant 0 : i32
    %c0_i32_0 = arith.constant 0 : i32
    %c0_i32_1 = arith.constant 0 : i32
    return %c0_i32, %c0_i32_0 : i32, i32
  }
  func.func @transform_6(%arg0: i32) -> (i32, i32) {
    %c0_i32 = arith.constant 0 : i32
    %c0_i32_0 = arith.constant 0 : i32
    return %arg0, %c0_i32 : i32, i32
  }
}

</mosaic_0001>

<bundles_post_ra>
// kernel: generator_forward.1
= control target key start
LH: loop header
LB: loop body
LE: loop exit
PB: predicated region body
PF: predicated region fallthrough
CT: control target
= control target key end

     0   :  { %11 = vsyncpa [#allocation3], 0  ;;  %s1536_s0 = inlined_call_operand.vmem [shape: bf16[8,128], index: 0, kind: input, shape index: {}]   ;;  %s1537_s1 = inlined_call_operand.hbm [shape: bf16[128,256], index: 1, kind: input, shape index: {}]   ;;  %s1538_s2 = inlined_call_operand.hbm [shape: bf16[256,512], index: 2, kind: input, shape index: {}]   ;;  %s1539_s3 = inlined_call_operand.vmem [shape: f32[1,512], index: 3, kind: input, shape index: {}]   ;;  %s1540_s4 = inlined_call_operand.hbm [shape: bf16[512,128], index: 4, kind: input, shape index: {}]   ;;  %s1541_s5 = inlined_call_operand.vmem [shape: f32[1,128], index: 5, kind: input, shape index: {}]   ;;  %s1542_s6 = inlined_call_operand.vmem [shape: bf16[8,128], index: 6, kind: output, shape index: {}]  }
   0x1   :  { %12 = vsyncpa [#allocation5], 0  ;;  %s1443_s21 = smov [#allocation4]   ;;  %s1373_s25 = scalar_lea.hbm %s1538_s2, 8192 }
   0x2   :  { %s32_s22 = sshll.u32 %s1443_s21, 4  ;;  %p1374_p0 = scmp.ne.s32.totalorder %s1538_s2, %s1373_s25  ;;  %s33_s22 = int_to_ptr.vmem [resolvable:$true] %s32_s22 }
   0x3   :  { %p1377_p1 = scmp.lt.u32.totalorder %s1373_s25, %s1538_s2 }
   0x5   :  { %p1379_p2 = pnand %p1377_p1, %p1374_p0 }
   0x7   :  { %1382 = shalt.err (!%p1379_p2)
}
   0x8   :  { %s1383_s30 = scalar_lea.vmem %s33_s22, 8192  ;;  %p1388_p4 = scmp.lt.s32.totalorder %s33_s22, %s33_s22 }
   0x9   :  { %p1384_p3 = scmp.ne.s32.totalorder %s33_s22, %s1383_s30  ;;  %p1389_p5 = scmp.lt.s32.totalorder %s1383_s30, %s1383_s30 }
   0xb   :  { %p1390_p6 = por %p1389_p5, %p1388_p4 }
   0xd   :  { %p1391_p7 = pnand %p1390_p6, %p1384_p3 }
   0xf   :  { %1394 = shalt.err (!%p1391_p7)
}
  0x10   :  { %s1444_s7 = smov 256   ;;  %s1445_s8 = smov 16  }
  0x11   :  { %38 = dma.hbm_to_vmem [thread:$0]  %s1538_s2, 8192, %s33_s22, [#allocation5], %s1444_s7, %s1444_s7, %s1445_s8  }
  0x12   :  { %s1446_s11 = smov [#allocation2]   ;;  %s1395_s15 = scalar_lea.hbm %s1537_s1, 2048 }
  0x13   :  { %s20_s12 = sshll.u32 %s1446_s11, 4  ;;  %p1396_p8 = scmp.ne.s32.totalorder %s1537_s1, %s1395_s15  ;;  %s21_s12 = int_to_ptr.vmem [resolvable:$true] %s20_s12 }
  0x14   :  { %p1399_p9 = scmp.lt.u32.totalorder %s1395_s15, %s1537_s1 }
  0x16   :  { %p1401_p10 = pnand %p1399_p9, %p1396_p8 }
  0x18   :  { %1404 = shalt.err (!%p1401_p10)
}
  0x19   :  { %s1405_s20 = scalar_lea.vmem %s21_s12, 2048  ;;  %p1410_p12 = scmp.lt.s32.totalorder %s21_s12, %s21_s12 }
  0x1a   :  { %p1406_p11 = scmp.ne.s32.totalorder %s21_s12, %s1405_s20  ;;  %p1411_p13 = scmp.lt.s32.totalorder %s1405_s20, %s1405_s20 }
  0x1c   :  { %p1412_p0 = por %p1411_p13, %p1410_p12 }
  0x1e   :  { %p1413_p1 = pnand %p1412_p0, %p1406_p11 }
  0x20   :  { %1416 = shalt.err (!%p1413_p1)
}
  0x21   :  { %s1447_s2 = smov 128   ;;  %s1448_s21 = smov 8  }
  0x22   :  { %26 = dma.hbm_to_vmem [thread:$0]  %s1537_s1, 2048, %s21_s12, [#allocation3], %s1447_s2, %s1447_s2, %s1448_s21  }
  0x23   :  { %s1449_s24 = smov [#allocation6]   ;;  %s1417_s28 = scalar_lea.hbm %s1540_s4, 4096 }
  0x24   :  { %s46_s25 = sshll.u32 %s1449_s24, 4  ;;  %p1418_p2 = scmp.ne.s32.totalorder %s1540_s4, %s1417_s28  ;;  %s47_s25 = int_to_ptr.vmem [resolvable:$true] %s46_s25 }
  0x25   :  { %p1421_p3 = scmp.lt.u32.totalorder %s1417_s28, %s1540_s4 }
  0x27   :  { %p1423_p4 = pnand %p1421_p3, %p1418_p2 }
  0x29   :  { %1426 = shalt.err (!%p1423_p4)
}
  0x2a   :  { %s1427_s9 = scalar_lea.vmem %s47_s25, 4096  ;;  %p1432_p6 = scmp.lt.s32.totalorder %s47_s25, %s47_s25 }
  0x2b   :  { %p1428_p5 = scmp.ne.s32.totalorder %s47_s25, %s1427_s9  ;;  %p1433_p7 = scmp.lt.s32.totalorder %s1427_s9, %s1427_s9 }
  0x2d   :  { %p1434_p8 = por %p1433_p7, %p1432_p6 }
  0x2f   :  { %p1435_p9 = pnand %p1434_p8, %p1428_p5 }
  0x31   :  { %1438 = shalt.err (!%p1435_p9)
}
  0x32   :  { %s1450_s1 = smov 64   ;;  %s1451_s10 = smov 4  }
  0x33   :  { %52 = dma.hbm_to_vmem [thread:$0]  %s1540_s4, 4096, %s47_s25, [#allocation5], %s1450_s1, %s1450_s1, %s1451_s10  }
  0x34   :  { %1439 = dma.done.wait [#allocation3], 2048  }
  0x35   :  { %1440 = vsyncadd [#allocation3], 4294965248 }
  0x36   :  { %1441 = dma.done.wait [#allocation5], 12288  }
  0x37   :  { %1442 = vsyncadd [#allocation5], 4294955008  ;;  %v1452_v0 = vmov 0   ;;  %v1221_v1 = vld [vmem:[#allocation2 + $0x4] ss:$8 sps:$4 sm:$0xff]  }
  0x38   :  { %194 = vmatprep.mubr.bf16.mxu0 %v1452_v0  ;;  %v1223_v2 = vld [vmem:[#allocation2] ss:$8 sps:$4 sm:$0xff]   ;;  %162 = vmatprep.subr.bf16.mxu0 %v1221_v1  ;;  %v1224_v3 = vld [vmem:[#allocation2 + $0x14] ss:$8 sps:$4 sm:$0xff]   ;;  %v1226_v4 = vld [vmem:[#allocation2 + $0x10] ss:$8 sps:$4 sm:$0xff]  }
  0x39   :  { %163 = vmatpush1.bf16.msra.mxu0 %v1223_v2  ;;  %v1227_v5 = vld [vmem:[#allocation2 + $0x24] ss:$8 sps:$4 sm:$0xff]   ;;  %v1229_v6 = vld [vmem:[#allocation2 + $0x20] ss:$8 sps:$4 sm:$0xff]   ;;  %v1230_v7 = vld [vmem:[#allocation2 + $0x34] ss:$8 sps:$4 sm:$0xff]  }
  0x3a   :  { %164 = vmatprep.subr.bf16.mxu0 %v1224_v3  ;;  %v1232_v8 = vld [vmem:[#allocation2 + $0x30] ss:$8 sps:$4 sm:$0xff]   ;;  %v1245_v9 = vld [vmem:[#allocation4 + $0x4] ss:$16 sps:$4 sm:$0xff]   ;;  %v1235_v13 = vld [vmem:[#allocation2 + $0x40] ss:$8 sps:$4 sm:$0xff]  }
  0x3b   :  { %v1233_v10 = vld [vmem:[#allocation2 + $0x44] ss:$8 sps:$4 sm:$0xff]   ;;  %613 = vmatprep.subr.bf16.mxu1 %v1245_v9  ;;  %v1250_v11 = vld [vmem:[#allocation4] ss:$16 sps:$4 sm:$0xff]   ;;  %v1236_v14 = vld [vmem:[#allocation2 + $0x54] ss:$8 sps:$4 sm:$0xff]  }
  0x3c   :  { %v1251_v12 = vld [vmem:[#allocation4 + $0x24] ss:$16 sps:$4 sm:$0xff]   ;;  %614 = vmatpush1.bf16.msra.mxu1 %v1250_v11  ;;  %v1256_v15 = vld [vmem:[#allocation4 + $0x20] ss:$16 sps:$4 sm:$0xff]   ;;  %v1249_v26 = vld [vmem:[#allocation4 + $0xc] ss:$16 sps:$4 sm:$0xff]  }
  0x3d   :  { %165 = vmatpush1.bf16.msra.mxu0 %v1226_v4  ;;  %615 = vmatprep.subr.bf16.mxu1 %v1251_v12  ;;  %v1257_v16 = vld [vmem:[#allocation4 + $0x44] ss:$16 sps:$4 sm:$0xff]   ;;  %v1238_v17 = vld [vmem:[#allocation2 + $0x50] ss:$8 sps:$4 sm:$0xff]   ;;  %v1241_v21 = vld [vmem:[#allocation2 + $0x60] ss:$8 sps:$4 sm:$0xff]  }
  0x3e   :  { %166 = vmatprep.subr.bf16.mxu0 %v1227_v5  ;;  %v1239_v18 = vld [vmem:[#allocation2 + $0x64] ss:$8 sps:$4 sm:$0xff]   ;;  %v1262_v19 = vld [vmem:[#allocation4 + $0x40] ss:$16 sps:$4 sm:$0xff]   ;;  %v1242_v22 = vld [vmem:[#allocation2 + $0x74] ss:$8 sps:$4 sm:$0xff]  }
  0x3f   :  { %v1263_v20 = vld [vmem:[#allocation4 + $0x64] ss:$16 sps:$4 sm:$0xff]   ;;  %v1268_v23 = vld [vmem:[#allocation4 + $0x60] ss:$16 sps:$4 sm:$0xff]   ;;  %v1247_v30 = vld [vmem:[#allocation4 + $0x8] ss:$16 sps:$4 sm:$0xff]  }
  0x40   :  { %616 = vmatpush1.bf16.msra.mxu1 %v1256_v15  ;;  %v1269_v24 = vld [vmem:[#allocation4 + $0x84] ss:$16 sps:$4 sm:$0xff]   ;;  %v1244_v25 = vld [vmem:[#allocation2 + $0x70] ss:$8 sps:$4 sm:$0xff]   ;;  %v65_v29 = vld [vmem:[%s1536_s0] sm:$0xf] }
  0x41   :  { %167 = vmatpush1.bf16.msra.mxu0 %v1229_v6  ;;  %617 = vmatprep.subr.bf16.mxu1 %v1257_v16  ;;  %v1274_v27 = vld [vmem:[#allocation4 + $0x80] ss:$16 sps:$4 sm:$0xff]   ;;  %v1275_v28 = vld [vmem:[#allocation4 + $0xa4] ss:$16 sps:$4 sm:$0xff]   ;;  %v1255_v31 = vld [vmem:[#allocation4 + $0x2c] ss:$16 sps:$4 sm:$0xff]  }
  0x42   :  { %168 = vmatprep.subr.bf16.mxu0 %v1230_v7  ;;  %v1280_v32 = vld [vmem:[#allocation4 + $0xa0] ss:$16 sps:$4 sm:$0xff]   ;;  %v1281_v33 = vld [vmem:[#allocation4 + $0xc4] ss:$16 sps:$4 sm:$0xff]   ;;  %v1253_v34 = vld [vmem:[#allocation4 + $0x28] ss:$16 sps:$4 sm:$0xff]  }
  0x43   :  { %v1261_v35 = vld [vmem:[#allocation4 + $0x4c] ss:$16 sps:$4 sm:$0xff]   ;;  %v1286_v36 = vld [vmem:[#allocation4 + $0xc0] ss:$16 sps:$4 sm:$0xff]   ;;  %v1287_v37 = vld [vmem:[#allocation4 + $0xe4] ss:$16 sps:$4 sm:$0xff]  }
  0x44   :  { %618 = vmatpush1.bf16.msra.mxu1 %v1262_v19  ;;  %v1259_v38 = vld [vmem:[#allocation4 + $0x48] ss:$16 sps:$4 sm:$0xff]   ;;  %v1267_v39 = vld [vmem:[#allocation4 + $0x6c] ss:$16 sps:$4 sm:$0xff]   ;;  %v1292_v40 = vld [vmem:[#allocation4 + $0xe0] ss:$16 sps:$4 sm:$0xff]  }
  0x45   :  { %169 = vmatpush1.bf16.msra.mxu0 %v1232_v8  ;;  %619 = vmatprep.subr.bf16.mxu1 %v1263_v20  ;;  %v1293_v41 = vld [vmem:[#allocation4 + $0x104] ss:$16 sps:$4 sm:$0xff]   ;;  %v1265_v42 = vld [vmem:[#allocation4 + $0x68] ss:$16 sps:$4 sm:$0xff]   ;;  %v1273_v43 = vld [vmem:[#allocation4 + $0x8c] ss:$16 sps:$4 sm:$0xff]  }
  0x46   :  { %170 = vmatprep.subr.bf16.mxu0 %v1233_v10  ;;  %v1298_v44 = vld [vmem:[#allocation4 + $0x100] ss:$16 sps:$4 sm:$0xff]   ;;  %v1299_v45 = vld [vmem:[#allocation4 + $0x124] ss:$16 sps:$4 sm:$0xff]   ;;  %v1271_v46 = vld [vmem:[#allocation4 + $0x88] ss:$16 sps:$4 sm:$0xff]  }
  0x47   :  { %v1279_v47 = vld [vmem:[#allocation4 + $0xac] ss:$16 sps:$4 sm:$0xff]   ;;  %v1304_v48 = vld [vmem:[#allocation4 + $0x120] ss:$16 sps:$4 sm:$0xff]   ;;  %v1305_v49 = vld [vmem:[#allocation4 + $0x144] ss:$16 sps:$4 sm:$0xff]  }
  0x48   :  { %620 = vmatpush1.bf16.msra.mxu1 %v1268_v23  ;;  %v1277_v50 = vld [vmem:[#allocation4 + $0xa8] ss:$16 sps:$4 sm:$0xff]   ;;  %v1285_v51 = vld [vmem:[#allocation4 + $0xcc] ss:$16 sps:$4 sm:$0xff]   ;;  %v1310_v52 = vld [vmem:[#allocation4 + $0x140] ss:$16 sps:$4 sm:$0xff]  }
  0x49   :  { %171 = vmatpush1.bf16.msra.mxu0 %v1235_v13  ;;  %621 = vmatprep.subr.bf16.mxu1 %v1269_v24  ;;  %v1311_v53 = vld [vmem:[#allocation4 + $0x164] ss:$16 sps:$4 sm:$0xff]   ;;  %v1283_v54 = vld [vmem:[#allocation4 + $0xc8] ss:$16 sps:$4 sm:$0xff]   ;;  %v1316_v55 = vld [vmem:[#allocation4 + $0x160] ss:$16 sps:$4 sm:$0xff]  }
  0x4a   :  { %172 = vmatprep.subr.bf16.mxu0 %v1236_v14  ;;  %v1291_v56 = vld [vmem:[#allocation4 + $0xec] ss:$16 sps:$4 sm:$0xff]   ;;  %v1317_v57 = vld [vmem:[#allocation4 + $0x184] ss:$16 sps:$4 sm:$0xff]   ;;  %v1289_v58 = vld [vmem:[#allocation4 + $0xe8] ss:$16 sps:$4 sm:$0xff]  }
  0x4b   :  { %v1322_v59 = vld [vmem:[#allocation4 + $0x180] ss:$16 sps:$4 sm:$0xff]   ;;  %v1297_v60 = vld [vmem:[#allocation4 + $0x10c] ss:$16 sps:$4 sm:$0xff]   ;;  %v1323_v61 = vld [vmem:[#allocation4 + $0x1a4] ss:$16 sps:$4 sm:$0xff]  }
  0x4c   :  { %622 = vmatpush1.bf16.msra.mxu1 %v1274_v27  ;;  %v1295_v62 = vld [vmem:[#allocation4 + $0x108] ss:$16 sps:$4 sm:$0xff]   ;;  %v1328_v63 = vld [vmem:[#allocation4 + $0x1a0] ss:$16 sps:$4 sm:$0xff]   ;;  %v1303_v0 = vld [vmem:[#allocation4 + $0x12c] ss:$16 sps:$4 sm:$0xff]  }
  0x4d   :  { %173 = vmatpush1.bf16.msra.mxu0 %v1238_v17  ;;  %623 = vmatprep.subr.bf16.mxu1 %v1275_v28  ;;  %v1329_v1 = vld [vmem:[#allocation4 + $0x1c4] ss:$16 sps:$4 sm:$0xff]   ;;  %v1301_v2 = vld [vmem:[#allocation4 + $0x128] ss:$16 sps:$4 sm:$0xff]   ;;  %v1309_v3 = vld [vmem:[#allocation4 + $0x14c] ss:$16 sps:$4 sm:$0xff]  }
  0x4e   :  { %174 = vmatprep.subr.bf16.mxu0 %v1239_v18  ;;  %v1307_v4 = vld [vmem:[#allocation4 + $0x148] ss:$16 sps:$4 sm:$0xff]   ;;  %v1315_v5 = vld [vmem:[#allocation4 + $0x16c] ss:$16 sps:$4 sm:$0xff]   ;;  %v1334_v13 = vld [vmem:[#allocation4 + $0x1c0] ss:$16 sps:$4 sm:$0xff]  }
  0x4f   :  { %v1313_v6 = vld [vmem:[#allocation4 + $0x168] ss:$16 sps:$4 sm:$0xff]   ;;  %v1321_v7 = vld [vmem:[#allocation4 + $0x18c] ss:$16 sps:$4 sm:$0xff]   ;;  %v1335_v14 = vld [vmem:[#allocation4 + $0x1e4] ss:$16 sps:$4 sm:$0xff]  }
  0x50   :  { %624 = vmatpush1.bf16.msra.mxu1 %v1280_v32  ;;  %v1319_v8 = vld [vmem:[#allocation4 + $0x188] ss:$16 sps:$4 sm:$0xff]   ;;  %v1327_v9 = vld [vmem:[#allocation4 + $0x1ac] ss:$16 sps:$4 sm:$0xff]   ;;  %v1340_v17 = vld [vmem:[#allocation4 + $0x1e0] ss:$16 sps:$4 sm:$0xff]  }
  0x51   :  { %175 = vmatpush1.bf16.msra.mxu0 %v1241_v21  ;;  %625 = vmatprep.subr.bf16.mxu1 %v1281_v33  ;;  %v1325_v10 = vld [vmem:[#allocation4 + $0x1a8] ss:$16 sps:$4 sm:$0xff]   ;;  %v1333_v11 = vld [vmem:[#allocation4 + $0x1cc] ss:$16 sps:$4 sm:$0xff]   ;;  %v1341_v18 = vld [vmem:[#allocation6 + $0x40] sm:$0xff]  }
  0x52   :  { %176 = vmatprep.subr.bf16.mxu0 %v1242_v22  ;;  %v1331_v12 = vld [vmem:[#allocation4 + $0x1c8] ss:$16 sps:$4 sm:$0xff]   ;;  %v1339_v15 = vld [vmem:[#allocation4 + $0x1ec] ss:$16 sps:$4 sm:$0xff]   ;;  %v1342_v19 = vld [vmem:[#allocation6 + $0xc0] sm:$0xff]  }
  0x53   :  { %v1337_v16 = vld [vmem:[#allocation4 + $0x1e8] ss:$16 sps:$4 sm:$0xff]   ;;  %v1343_v27 = vld [vmem:[#allocation6] sm:$0xff]  }
  0x54   :  { %626 = vmatpush1.bf16.msra.mxu1 %v1286_v36  ;;  %v1344_v28 = vld [vmem:[#allocation6 + $0x80] sm:$0xff]   ;;  %v1347_v32 = vld [vmem:[#allocation6 + $0x8] sm:$0xff]   ;;  %v1351_v36 = vld [vmem:[#allocation6 + $0x10] sm:$0xff]  }
  0x55   :  { %177 = vmatpush1.bf16.msra.mxu0 %v1244_v25  ;;  %627 = vmatprep.subr.bf16.mxu1 %v1287_v37  ;;  %v1348_v33 = vld [vmem:[#allocation6 + $0x88] sm:$0xff]   ;;  %v1352_v37 = vld [vmem:[#allocation6 + $0x90] sm:$0xff]  }
  0x56   :  { %654 = vmatprep.subr.bf16.mxu0 %v1249_v26 }
  0x58   :  { %195 = vmatmul.mubr.bf16.vlgmr.msra.gmra.mrb[0].mxu0 %v65_v29  ;;  %628 = vmatpush1.bf16.msra.mxu1 %v1292_v40  ;;  %v1355_v40 = vld [vmem:[#allocation6 + $0x18] sm:$0xff]  }
  0x59   :  { %655 = vmatpush1.bf16.msra.mxu0 %v1247_v30  ;;  %629 = vmatprep.subr.bf16.mxu1 %v1293_v41  ;;  %v1345_v30 = vld [vmem:[#allocation6 + $0x48] sm:$0xff]   ;;  %v1356_v41 = vld [vmem:[#allocation6 + $0x98] sm:$0xff]  }
  0x5a   :  { %656 = vmatprep.subr.bf16.mxu0 %v1255_v31  ;;  %v1346_v31 = vld [vmem:[#allocation6 + $0xc8] sm:$0xff]  }
  0x5c   :  { %630 = vmatpush1.bf16.msra.mxu1 %v1298_v44  ;;  %v1359_v44 = vld [vmem:[#allocation6 + $0x20] sm:$0xff]  }
  0x5d   :  { %657 = vmatpush1.bf16.msra.mxu0 %v1253_v34  ;;  %631 = vmatprep.subr.bf16.mxu1 %v1299_v45  ;;  %v1349_v34 = vld [vmem:[#allocation6 + $0x50] sm:$0xff]   ;;  %v1360_v45 = vld [vmem:[#allocation6 + $0xa0] sm:$0xff]  }
  0x5e   :  { %658 = vmatprep.subr.bf16.mxu0 %v1261_v35  ;;  %v1350_v35 = vld [vmem:[#allocation6 + $0xd0] sm:$0xff]  }
  0x60   :  { %632 = vmatpush1.bf16.msra.mxu1 %v1304_v48  ;;  %v1363_v48 = vld [vmem:[#allocation6 + $0x28] sm:$0xff]  }
  0x61   :  { %659 = vmatpush1.bf16.msra.mxu0 %v1259_v38  ;;  %633 = vmatprep.subr.bf16.mxu1 %v1305_v49  ;;  %v1353_v38 = vld [vmem:[#allocation6 + $0x58] sm:$0xff]   ;;  %v1364_v49 = vld [vmem:[#allocation6 + $0xa8] sm:$0xff]  }
  0x62   :  { %660 = vmatprep.subr.bf16.mxu0 %v1267_v39  ;;  %v1354_v39 = vld [vmem:[#allocation6 + $0xd8] sm:$0xff]  }
  0x64   :  { %634 = vmatpush1.bf16.msra.mxu1 %v1310_v52  ;;  %v1367_v52 = vld [vmem:[#allocation6 + $0x30] sm:$0xff]  }
  0x65   :  { %661 = vmatpush1.bf16.msra.mxu0 %v1265_v42  ;;  %635 = vmatprep.subr.bf16.mxu1 %v1311_v53  ;;  %v1357_v42 = vld [vmem:[#allocation6 + $0x60] sm:$0xff]   ;;  %v1368_v53 = vld [vmem:[#allocation6 + $0xb0] sm:$0xff]  }
  0x66   :  { %662 = vmatprep.subr.bf16.mxu0 %v1273_v43  ;;  %v1358_v43 = vld [vmem:[#allocation6 + $0xe0] sm:$0xff]  }
  0x68   :  { %636 = vmatpush1.bf16.msra.mxu1 %v1316_v55  ;;  %v1370_v55 = vld [vmem:[#allocation6 + $0xf8] sm:$0xff]  }
  0x69   :  { %663 = vmatpush1.bf16.msra.mxu0 %v1271_v46  ;;  %637 = vmatprep.subr.bf16.mxu1 %v1317_v57  ;;  %v1361_v46 = vld [vmem:[#allocation6 + $0x68] sm:$0xff]   ;;  %v1372_v57 = vld [vmem:[#allocation6 + $0xb8] sm:$0xff]  }
  0x6a   :  { %664 = vmatprep.subr.bf16.mxu0 %v1279_v47  ;;  %v1362_v47 = vld [vmem:[#allocation6 + $0xe8] sm:$0xff]  }
  0x6c   :  { %638 = vmatpush1.bf16.msra.mxu1 %v1322_v59 }
  0x6d   :  { %665 = vmatpush1.bf16.msra.mxu0 %v1277_v50  ;;  %639 = vmatprep.subr.bf16.mxu1 %v1323_v61  ;;  %v1365_v50 = vld [vmem:[#allocation6 + $0x70] sm:$0xff]  }
  0x6e   :  { %666 = vmatprep.subr.bf16.mxu0 %v1285_v51  ;;  %v1366_v51 = vld [vmem:[#allocation6 + $0xf0] sm:$0xff]  }
  0x70   :  { %640 = vmatpush1.bf16.msra.mxu1 %v1328_v63 }
  0x71   :  { %667 = vmatpush1.bf16.msra.mxu0 %v1283_v54  ;;  %641 = vmatprep.subr.bf16.mxu1 %v1329_v1  ;;  %v1369_v54 = vld [vmem:[#allocation6 + $0x78] sm:$0xff]  }
  0x72   :  { %668 = vmatprep.subr.bf16.mxu0 %v1291_v56  ;;  %v1371_v56 = vld [vmem:[#allocation6 + $0x38] sm:$0xff]  }
  0x74   :  { %642 = vmatpush1.bf16.msra.mxu1 %v1334_v13 }
  0x75   :  { %669 = vmatpush1.bf16.msra.mxu0 %v1289_v58  ;;  %643 = vmatprep.subr.bf16.mxu1 %v1335_v14  ;;  %v273_v58 = vlaneseq }
  0x76   :  { %670 = vmatprep.subr.bf16.mxu0 %v1297_v60 }
  0x77   :  { %v274_v59 = vshrl.u32 %v273_v58, 7 }
  0x78   :  { %644 = vmatpush1.bf16.msra.mxu1 %v1340_v17 }
  0x79   :  { %671 = vmatpush1.bf16.msra.mxu0 %v1295_v62  ;;  %1167 = vmatprep.subr.bf16.mxu1 %v1341_v18  ;;  %v275_v60 = vsub.s32 0, %v274_v59  ;;  %v283_v61 = vsub.s32 2, %v274_v59  ;;  %v271_v62 = vld [vmem:[%s1539_s3] sm:$0xf]  ;;  %v279_v63 = vsub.s32 1, %v274_v59 }
  0x7a   :  { %672 = vmatprep.subr.bf16.mxu0 %v1303_v0  ;;  %v287_v0 = vsub.s32 3, %v274_v59 }
  0x7b   :  { %v276_v1 = vrot.slane %v271_v62, %v275_v60 }
  0x7d   :  { %673 = vmatpush1.bf16.msra.mxu0 %v1301_v2  ;;  %v284_v2 = vrot.slane %v271_v62, %v283_v61 }
  0x7e   :  { %674 = vmatprep.subr.bf16.mxu0 %v1309_v3  ;;  %v280_v3 = vrot.slane %v271_v62, %v279_v63 }
  0x81   :  { %675 = vmatpush1.bf16.msra.mxu0 %v1307_v4  ;;  %v288_v4 = vrot.slane %v271_v62, %v287_v0 }
  0x82   :  { %676 = vmatprep.subr.bf16.mxu0 %v1315_v5 }
  0x85   :  { %677 = vmatpush1.bf16.msra.mxu0 %v1313_v6 }
  0x86   :  { %678 = vmatprep.subr.bf16.mxu0 %v1321_v7 }
  0x89   :  { %679 = vmatpush1.bf16.msra.mxu0 %v1319_v8 }
  0x8a   :  { %680 = vmatprep.subr.bf16.mxu0 %v1327_v9 }
  0x8d   :  { %681 = vmatpush1.bf16.msra.mxu0 %v1325_v10 }
  0x8e   :  { %682 = vmatprep.subr.bf16.mxu0 %v1333_v11 }
  0x91   :  { %683 = vmatpush1.bf16.msra.mxu0 %v1331_v12 }
  0x92   :  { %684 = vmatprep.subr.bf16.mxu0 %v1339_v15 }
  0x95   :  { %685 = vmatpush1.bf16.msra.mxu0 %v1337_v16 }
  0x96   :  { %1189 = vmatprep.subr.bf16.mxu0 %v1342_v19 }
 0x12b   :  { %v196_v20 = vpop.f32.mrb[0].mxu0 }
 0x12c   :  { %v203_v21 = vmax.f32 %v196_v20, 0.0  ;;  %v198_v22 = vpop.f32.mrb[1].mxu0 }
 0x12d   :  { %v204_v23 = vmax.f32 %v198_v22, 0.0  ;;  %v200_v24 = vpop.f32.mrb[2].mxu0 }
 0x12e   :  { %v201_v25 = vpop.f32.mrb[3].mxu0  ;;  %v205_v29 = vpack.c.bf16 %v203_v21, %v203_v21 }
 0x12f   :  { %v206_v26 = vpack.c.bf16 %v204_v23, %v204_v23 }
 0x131   :  { %645 = vmatprep.mubr.bf16.mxu1 %v206_v26  ;;  %686 = vmatprep.mubr.bf16.mxu0 %v206_v26 }
 0x132   :  { %646 = vmatmul.mubr.bf16.vlgmr.msra.gmra.mrb[0].mxu1 %v205_v29  ;;  %687 = vmatmul.mubr.bf16.vlgmr.msra.gmra.mrb[4].mxu0 %v205_v29 }
 0x133   :  { %1168 = vmatpush3.bf16.msra.mxu1 %v1343_v27  ;;  %1190 = vmatpush3.bf16.msra.mxu0 %v1344_v28  ;;  %v1134_v27 = vld [vmem:[%s1541_s5] ss:$0 sm:$0xff] }
 0x134   :  { %1169 = vmatprep.subr.bf16.mxu1 %v1345_v30  ;;  %1191 = vmatprep.subr.bf16.mxu0 %v1346_v31 }
 0x137   :  { %1170 = vmatpush3.bf16.msra.mxu1 %v1347_v32  ;;  %1192 = vmatpush3.bf16.msra.mxu0 %v1348_v33 }
 0x138   :  { %1171 = vmatprep.subr.bf16.mxu1 %v1349_v34  ;;  %1193 = vmatprep.subr.bf16.mxu0 %v1350_v35 }
 0x13b   :  { %1172 = vmatpush3.bf16.msra.mxu1 %v1351_v36  ;;  %1194 = vmatpush3.bf16.msra.mxu0 %v1352_v37 }
 0x13c   :  { %1173 = vmatprep.subr.bf16.mxu1 %v1353_v38  ;;  %1195 = vmatprep.subr.bf16.mxu0 %v1354_v39 }
 0x13f   :  { %1174 = vmatpush3.bf16.msra.mxu1 %v1355_v40  ;;  %1196 = vmatpush3.bf16.msra.mxu0 %v1356_v41 }
 0x140   :  { %1175 = vmatprep.subr.bf16.mxu1 %v1357_v42  ;;  %1197 = vmatprep.subr.bf16.mxu0 %v1358_v43 }
 0x143   :  { %1176 = vmatpush3.bf16.msra.mxu1 %v1359_v44  ;;  %1198 = vmatpush3.bf16.msra.mxu0 %v1360_v45 }
 0x144   :  { %1177 = vmatprep.subr.bf16.mxu1 %v1361_v46  ;;  %1199 = vmatprep.subr.bf16.mxu0 %v1362_v47 }
 0x147   :  { %1178 = vmatpush3.bf16.msra.mxu1 %v1363_v48  ;;  %1200 = vmatpush3.bf16.msra.mxu0 %v1364_v49 }
 0x148   :  { %1179 = vmatprep.subr.bf16.mxu1 %v1365_v50  ;;  %1201 = vmatprep.subr.bf16.mxu0 %v1366_v51 }
 0x14b   :  { %1180 = vmatpush3.bf16.msra.mxu1 %v1367_v52  ;;  %1202 = vmatpush3.bf16.msra.mxu0 %v1368_v53 }
 0x14c   :  { %1181 = vmatprep.subr.bf16.mxu1 %v1369_v54  ;;  %1203 = vmatprep.subr.bf16.mxu0 %v1370_v55 }
 0x14f   :  { %1182 = vmatpush3.bf16.msra.mxu1 %v1371_v56  ;;  %1204 = vmatpush3.bf16.msra.mxu0 %v1372_v57 }
 0x205   :  { %v647_v5 = vpop.f32.mrb[0].mxu1  ;;  %v688_v6 = vpop.f32.mrb[4].mxu0 }
 0x206   :  { %v648_v7 = vadd.f32 %v647_v5, %v276_v1  ;;  %v689_v8 = vadd.f32 %v688_v6, %v284_v2  ;;  %v649_v9 = vpop.f32.mrb[1].mxu1  ;;  %v690_v10 = vpop.f32.mrb[5].mxu0 }
 0x207   :  { %v650_v11 = vadd.f32 %v649_v9, %v280_v3  ;;  %v691_v12 = vadd.f32 %v690_v10, %v288_v4  ;;  %v651_v13 = vpop.f32.mrb[2].mxu1  ;;  %v692_v14 = vpop.f32.mrb[6].mxu0 }
 0x208   :  { %v695_v15 = vmax.f32 %v648_v7, 0.0  ;;  %v697_v16 = vmax.f32 %v689_v8, 0.0  ;;  %v652_v17 = vpop.f32.mrb[3].mxu1  ;;  %v693_v18 = vpop.f32.mrb[7].mxu0 }
 0x209   :  { %v696_v19 = vmax.f32 %v650_v11, 0.0  ;;  %v698_v20 = vmax.f32 %v691_v12, 0.0 }
 0x20a   :  { %v699_v23 = vpack.c.bf16 %v695_v15, %v695_v15  ;;  %v701_v24 = vpack.c.bf16 %v697_v16, %v697_v16 }
 0x20b   :  { %v700_v21 = vpack.c.bf16 %v696_v19, %v696_v19  ;;  %v702_v22 = vpack.c.bf16 %v698_v20, %v698_v20 }
 0x20d   :  { %998 = vmatprep.mubr.bf16.mxu1 %v700_v21  ;;  %1038 = vmatprep.mubr.bf16.mxu0 %v702_v22 }
 0x20e   :  { %999 = vmatmul.mubr.bf16.vlgmr.msra.gmra.mrb[4].mxu1 %v699_v23  ;;  %1039 = vmatmul.mubr.bf16.vlgmr.msra.gmra.mrb[8].mxu0 %v701_v24 }
 0x2e1   :  { %v1183_v25 = vpop.f32.mrb[4].mxu1  ;;  %v1205_v26 = vpop.f32.mrb[8].mxu0 }
 0x2e2   :  { %v1184_v28 = vpop.f32.mrb[5].mxu1  ;;  %v1206_v29 = vpop.f32.mrb[9].mxu0 }
 0x2e3   :  { %v1185_v30 = vadd.f32 %v1184_v28, %v1183_v25  ;;  %v1207_v31 = vadd.f32 %v1206_v29, %v1205_v26  ;;  %v1186_v32 = vpop.f32.mrb[6].mxu1  ;;  %v1208_v33 = vpop.f32.mrb[10].mxu0 }
 0x2e4   :  { %v1187_v34 = vpop.f32.mrb[7].mxu1  ;;  %v1209_v35 = vpop.f32.mrb[11].mxu0 }
 0x2e5   :  { %v1001_v36 = vadd.f32 %v1185_v30, %v1134_v27 }
 0x2e7   :  { %v1041_v37 = vadd.f32 %v1207_v31, %v1001_v36 }
 0x2e9   :  { %v1046_v38 = vpack.c.bf16 %v1041_v37, %v1041_v37 }
 0x2eb   :  { %1047 = vst [vmem:[%s1542_s6] sm:$0xf] %v1046_v38 }
 0x2ec   :  { %1052 = vsyncpa [#allocation3], 1 }
 0x2ed   :  { %1053 = vsyncpa [#allocation5], 1 }

</bundles_post_ra>
